<compile_context>
chip_gen: v7x
topology: tpu7x:2x2x1
jax: 0.10.0
libtpu: 0.0.40
codegen_flags: <defaults>
</compile_context>

<pallas_src>
import functools

import jax
import jax.numpy as jnp
from jax import lax
from jax.experimental import pallas as pl
from jax.experimental.pallas import tpu as pltpu


def mha_kernel(x_ref, wqkv_ref, wout_ref, bo_ref, o_ref, ctx_ref, *,
               num_heads, head_dim, d_out):
    x = x_ref[0]                                   # (T, D_in)
    mxu_dt = x_ref.dtype                           # bf16 if caller passes bf16 (v6e/v7x)

    # Fused QKV projection — one big lane-dense MXU matmul (scale pre-folded
    # into the query columns).  Accumulate in f32, cast to MXU dtype ONCE.
    qkv = jnp.dot(x, wqkv_ref[...],
                  preferred_element_type=jnp.float32).astype(mxu_dt)   # (T, 3*D_out)

    T = x.shape[0]
    # Causal predicate built once, shared by all heads (no per-head compares).
    row = lax.broadcasted_iota(jnp.int32, (T, T), 0)
    col = lax.broadcasted_iota(jnp.int32, (T, T), 1)
    causal_mask = col > row
    neg_big = jnp.float32(-1e30)

    # Contract last dim of Q with last dim of K — no materialized K transpose.
    qk_dnums = (((1,), (1,)), ((), ()))

    for h in range(num_heads):                     # static unroll; num_heads < 8 here
        lo = h * head_dim
        q = qkv[:, lo:lo + head_dim]                              # (T, hd), pre-scaled
        k = qkv[:, d_out + lo:d_out + lo + head_dim]              # (T, hd)
        v = qkv[:, 2 * d_out + lo:2 * d_out + lo + head_dim]      # (T, hd)

        scores = lax.dot_general(q, k, dimension_numbers=qk_dnums,
                                 preferred_element_type=jnp.float32)   # (T, T) f32
        scores = jnp.where(causal_mask, neg_big, scores)

        # Numerically stable softmax over keys, kept in f32 on all chips.
        m = jnp.max(scores, axis=-1, keepdims=True)
        p = jnp.exp(scores - m)                                    # (T, T) f32
        denom = jnp.sum(p, axis=-1, keepdims=True)                 # (T, 1)  f32

        # PV matmul first, normalize after: (T, hd) multiply instead of (T, T).
        pv = jnp.dot(p.astype(mxu_dt), v,
                     preferred_element_type=jnp.float32)           # (T, hd) f32
        ctx_ref[:, lo:lo + head_dim] = (
            pv * pl.reciprocal(denom, approx=True)                 # EUP reciprocal
        ).astype(ctx_ref.dtype)

    # Single lane-dense output projection across all heads + bias, one store.
    # ctx scratch is already in the MXU dtype — no extra cast pass here.
    out = jnp.dot(ctx_ref[...], wout_ref[...],
                  preferred_element_type=jnp.float32)              # (T, D_out) f32
    out = out + bo_ref[...].astype(jnp.float32)
    o_ref[0] = out.astype(o_ref.dtype)


def multi_head_attention(x, wq, wk, wv, wo, bo, *, num_heads):
    """x: (B, T, D_in). Weights in PyTorch nn.Linear layout: W (out, in), b (out,)."""
    B, T, D_in = x.shape
    D_out = wq.shape[0]
    assert D_out % num_heads == 0, "output_dim must be divisible by num_heads"
    hd = D_out // num_heads
    scale = 1.0 / (hd ** 0.5)
    dt = x.dtype

    # Fuse Q/K/V weights into one (D_in, 3*D_out) matrix, fold the softmax
    # scale into the query columns, and cast everything to x.dtype so the MXU
    # operands are uniform (full-rate bf16 path when the caller passes bf16).
    w_qkv = jnp.concatenate([wq.T * scale, wk.T, wv.T], axis=1).astype(dt)  # (D_in, 3*D_out)
    w_out = wo.T.astype(dt)                                                 # (D_out, D_out)
    bo_2d = bo.reshape(1, D_out).astype(dt)

    kernel = functools.partial(mha_kernel, num_heads=num_heads,
                               head_dim=hd, d_out=D_out)

    return pl.pallas_call(
        kernel,
        out_shape=jax.ShapeDtypeStruct((B, T, D_out), dt),
        grid_spec=pltpu.PrefetchScalarGridSpec(
            num_scalar_prefetch=0,
            grid=(B,),
            in_specs=[
                pl.BlockSpec((1, T, D_in), lambda b: (b, 0, 0)),     # x (per batch)
                pl.BlockSpec((D_in, 3 * D_out), lambda b: (0, 0)),   # fused QKV weight (resident)
                pl.BlockSpec((D_out, D_out), lambda b: (0, 0)),      # output-proj weight (resident)
                pl.BlockSpec((1, D_out), lambda b: (0, 0)),          # output bias (resident)
            ],
            out_specs=pl.BlockSpec((1, T, D_out), lambda b: (b, 0, 0)),
            # Per-head context collector, kept in the MXU dtype (each band
            # written exactly once, so no f32 accumulation is needed).
            scratch_shapes=[pltpu.VMEM((T, D_out), dt)],
        ),
        compiler_params=pltpu.CompilerParams(
            dimension_semantics=("parallel",),   # batch axis parallel (megacore / v7x 2 TCs)
            vmem_limit_bytes=32 * 1024 * 1024,   # raise v5e's 16 MiB default scoped VMEM
        ),
    )(x, w_qkv, w_out, bo_2d)


def reference_mha(x, wq, wk, wv, wo, bo, *, num_heads):
    B, T, D_in = x.shape
    D_out = wq.shape[0]
    hd = D_out // num_heads
    q = (x @ wq.T).reshape(B, T, num_heads, hd).transpose(0, 2, 1, 3)
    k = (x @ wk.T).reshape(B, T, num_heads, hd).transpose(0, 2, 1, 3)
    v = (x @ wv.T).reshape(B, T, num_heads, hd).transpose(0, 2, 1, 3)
    scores = jnp.einsum("bhqd,bhkd->bhqk", q, k)
    mask = jnp.triu(jnp.ones((T, T), bool), k=1)
    scores = jnp.where(mask, -jnp.inf, scores)
    attn = jax.nn.softmax(scores / (hd ** 0.5), axis=-1)
    ctx = jnp.einsum("bhqk,bhkd->bhqd", attn, v)
    ctx = ctx.transpose(0, 2, 1, 3).reshape(B, T, D_out)
    return ctx @ wo.T + bo


if __name__ == "__main__":
    # Small shapes consistent with the module's forward.
    B, T = 2, 8
    input_dim, output_dim, num_heads = 32, 32, 4

    key = jax.random.PRNGKey(0)
    kx, kq, kk, kv, ko, kb = jax.random.split(key, 6)
    x = jax.random.normal(kx, (B, T, input_dim), jnp.float32)
    # Deterministic synthetic parameters (nn.Linear layout: (out_features, in_features)).
    wq = jax.random.normal(kq, (output_dim, input_dim), jnp.float32) * 0.1
    wk = jax.random.normal(kk, (output_dim, input_dim), jnp.float32) * 0.1
    wv = jax.random.normal(kv, (output_dim, input_dim), jnp.float32) * 0.1
    wo = jax.random.normal(ko, (output_dim, output_dim), jnp.float32) * 0.1
    bo = jax.random.normal(kb, (output_dim,), jnp.float32) * 0.1

    out = multi_head_attention(x, wq, wk, wv, wo, bo, num_heads=num_heads)
    out = jax.block_until_ready(out)

    ref = reference_mha(x, wq, wk, wv, wo, bo, num_heads=num_heads)
    assert out.shape == (B, T, output_dim)
    # Tolerance leaves room for the EUP approximate reciprocal in the softmax.
    assert jnp.allclose(out, ref, atol=1e-3, rtol=1e-3), "mismatch vs reference"

    print("KERNEL_OK")
</pallas_src>

<mosaic_0001>
module attributes {stable_mosaic.version = 11 : i64} {
  func.func @mha_kernel(%arg0: i32, %arg1: memref<1x8x32xf32, #tpu.memory_space<vmem>>, %arg2: memref<32x96xf32, #tpu.memory_space<vmem>>, %arg3: memref<32x32xf32, #tpu.memory_space<vmem>>, %arg4: memref<1x32xf32, #tpu.memory_space<vmem>>, %arg5: memref<1x8x32xf32, #tpu.memory_space<vmem>>, %arg6: memref<8x32xf32, #tpu.memory_space<vmem>>) attributes {dimension_semantics = [#tpu.dimension_semantics<parallel>], iteration_bounds = array<i64: 2>, scalar_prefetch = 0 : i64, scratch_operands = 1 : i64, tpu.core_type = #tpu.core_type<tc>, window_params = [{transform_indices = @transform_0, window_bounds = array<i64: 1, 8, 32>}, {pipeline_mode = #tpu.pipeline_mode<synchronous>, transform_indices = @transform_1, window_bounds = array<i64: 32, 96>}, {pipeline_mode = #tpu.pipeline_mode<synchronous>, transform_indices = @transform_2, window_bounds = array<i64: 32, 32>}, {pipeline_mode = #tpu.pipeline_mode<synchronous>, transform_indices = @transform_3, window_bounds = array<i64: 1, 32>}, {transform_indices = @transform_4, window_bounds = array<i64: 1, 8, 32>}]} {
    %c0 = arith.constant 0 : index
    %c0_0 = arith.constant 0 : index
    %c0_1 = arith.constant 0 : index
    %0 = vector.load %arg1[%c0, %c0_0, %c0_1] : memref<1x8x32xf32, #tpu.memory_space<vmem>>, vector<1x8x32xf32>
    %1 = vector.shape_cast %0 : vector<1x8x32xf32> to vector<8x32xf32>
    %c0_2 = arith.constant 0 : index
    %c0_3 = arith.constant 0 : index
    %2 = vector.load %arg2[%c0_2, %c0_3] : memref<32x96xf32, #tpu.memory_space<vmem>>, vector<32x96xf32>
    %cst = arith.constant dense<0.000000e+00> : vector<8x96xf32>
    %3 = tpu.matmul %1, %2, %cst {dimension_numbers = #tpu.dot_dimension_numbers<[1], [0], [0], [1], [0, 0, 1, 1], [], []>} : vector<8x32xf32>, vector<32x96xf32>, vector<8x96xf32> -> vector<8x96xf32>
    %4 = tpu.iota {dimensions = array<i32: 0>} : vector<8x8xi32>
    %5 = tpu.iota {dimensions = array<i32: 1>} : vector<8x8xi32>
    %6 = arith.cmpi sgt, %5, %4 : vector<8x8xi32>
    %7 = vector.extract_strided_slice %3 {offsets = [0, 0], sizes = [8, 8], strides = [1, 1]} : vector<8x96xf32> to vector<8x8xf32>
    %8 = vector.extract_strided_slice %3 {offsets = [0, 32], sizes = [8, 8], strides = [1, 1]} : vector<8x96xf32> to vector<8x8xf32>
    %9 = vector.extract_strided_slice %3 {offsets = [0, 64], sizes = [8, 8], strides = [1, 1]} : vector<8x96xf32> to vector<8x8xf32>
    %cst_4 = arith.constant dense<0.000000e+00> : vector<8x8xf32>
    %10 = tpu.matmul %7, %8, %cst_4 {dimension_numbers = #tpu.dot_dimension_numbers<[1], [1], [0], [0], [0, 0, 1, 0], [], []>} : vector<8x8xf32>, vector<8x8xf32>, vector<8x8xf32> -> vector<8x8xf32>
    %cst_5 = arith.constant -1.000000e+30 : f32
    %11 = vector.broadcast %cst_5 : f32 to vector<8x8xf32>
    %12 = arith.select %6, %11, %10 : vector<8x8xi1>, vector<8x8xf32>
    %cst_6 = arith.constant dense<0xFF800000> : vector<8xf32>
    %13 = vector.multi_reduction <maximumf>, %12, %cst_6 [1] : vector<8x8xf32> to vector<8xf32>
    %14 = vector.shape_cast %13 : vector<8xf32> to vector<8x1xf32>
    %15 = vector.broadcast %14 : vector<8x1xf32> to vector<8x8xf32>
    %16 = arith.subf %12, %15 : vector<8x8xf32>
    %17 = math.exp %16 : vector<8x8xf32>
    %cst_7 = arith.constant dense<0.000000e+00> : vector<8xf32>
    %18 = vector.multi_reduction <add>, %17, %cst_7 [1] : vector<8x8xf32> to vector<8xf32>
    %19 = vector.shape_cast %18 : vector<8xf32> to vector<8x1xf32>
    %cst_8 = arith.constant dense<0.000000e+00> : vector<8x8xf32>
    %20 = tpu.matmul %17, %9, %cst_8 {dimension_numbers = #tpu.dot_dimension_numbers<[1], [0], [0], [1], [0, 0, 1, 1], [], []>} : vector<8x8xf32>, vector<8x8xf32>, vector<8x8xf32> -> vector<8x8xf32>
    %21 = tpu.reciprocal %19 {approx = true} : vector<8x1xf32> -> vector<8x1xf32>
    %22 = vector.broadcast %21 : vector<8x1xf32> to vector<8x8xf32>
    %23 = arith.mulf %20, %22 : vector<8x8xf32>
    %c0_9 = arith.constant 0 : index
    %c0_10 = arith.constant 0 : index
    %24 = vector.load %arg6[%c0_9, %c0_10] : memref<8x32xf32, #tpu.memory_space<vmem>>, vector<8x8xf32>
    tpu.vector_store %arg6[%c0_9, %c0_10], %23 {strides = array<i32>} : memref<8x32xf32, #tpu.memory_space<vmem>>, vector<8x8xf32>,
    %25 = vector.extract_strided_slice %3 {offsets = [0, 8], sizes = [8, 8], strides = [1, 1]} : vector<8x96xf32> to vector<8x8xf32>
    %26 = vector.extract_strided_slice %3 {offsets = [0, 40], sizes = [8, 8], strides = [1, 1]} : vector<8x96xf32> to vector<8x8xf32>
    %27 = vector.extract_strided_slice %3 {offsets = [0, 72], sizes = [8, 8], strides = [1, 1]} : vector<8x96xf32> to vector<8x8xf32>
    %cst_11 = arith.constant dense<0.000000e+00> : vector<8x8xf32>
    %28 = tpu.matmul %25, %26, %cst_11 {dimension_numbers = #tpu.dot_dimension_numbers<[1], [1], [0], [0], [0, 0, 1, 0], [], []>} : vector<8x8xf32>, vector<8x8xf32>, vector<8x8xf32> -> vector<8x8xf32>
    %cst_12 = arith.constant -1.000000e+30 : f32
    %29 = vector.broadcast %cst_12 : f32 to vector<8x8xf32>
    %30 = arith.select %6, %29, %28 : vector<8x8xi1>, vector<8x8xf32>
    %cst_13 = arith.constant dense<0xFF800000> : vector<8xf32>
    %31 = vector.multi_reduction <maximumf>, %30, %cst_13 [1] : vector<8x8xf32> to vector<8xf32>
    %32 = vector.shape_cast %31 : vector<8xf32> to vector<8x1xf32>
    %33 = vector.broadcast %32 : vector<8x1xf32> to vector<8x8xf32>
    %34 = arith.subf %30, %33 : vector<8x8xf32>
    %35 = math.exp %34 : vector<8x8xf32>
    %cst_14 = arith.constant dense<0.000000e+00> : vector<8xf32>
    %36 = vector.multi_reduction <add>, %35, %cst_14 [1] : vector<8x8xf32> to vector<8xf32>
    %37 = vector.shape_cast %36 : vector<8xf32> to vector<8x1xf32>
    %cst_15 = arith.constant dense<0.000000e+00> : vector<8x8xf32>
    %38 = tpu.matmul %35, %27, %cst_15 {dimension_numbers = #tpu.dot_dimension_numbers<[1], [0], [0], [1], [0, 0, 1, 1], [], []>} : vector<8x8xf32>, vector<8x8xf32>, vector<8x8xf32> -> vector<8x8xf32>
    %39 = tpu.reciprocal %37 {approx = true} : vector<8x1xf32> -> vector<8x1xf32>
    %40 = vector.broadcast %39 : vector<8x1xf32> to vector<8x8xf32>
    %41 = arith.mulf %38, %40 : vector<8x8xf32>
    %c0_16 = arith.constant 0 : index
    %c8 = arith.constant 8 : index
    %42 = vector.load %arg6[%c0_16, %c8] : memref<8x32xf32, #tpu.memory_space<vmem>>, vector<8x8xf32>
    tpu.vector_store %arg6[%c0_16, %c8], %41 {strides = array<i32>} : memref<8x32xf32, #tpu.memory_space<vmem>>, vector<8x8xf32>,
    %43 = vector.extract_strided_slice %3 {offsets = [0, 16], sizes = [8, 8], strides = [1, 1]} : vector<8x96xf32> to vector<8x8xf32>
    %44 = vector.extract_strided_slice %3 {offsets = [0, 48], sizes = [8, 8], strides = [1, 1]} : vector<8x96xf32> to vector<8x8xf32>
    %45 = vector.extract_strided_slice %3 {offsets = [0, 80], sizes = [8, 8], strides = [1, 1]} : vector<8x96xf32> to vector<8x8xf32>
    %cst_17 = arith.constant dense<0.000000e+00> : vector<8x8xf32>
    %46 = tpu.matmul %43, %44, %cst_17 {dimension_numbers = #tpu.dot_dimension_numbers<[1], [1], [0], [0], [0, 0, 1, 0], [], []>} : vector<8x8xf32>, vector<8x8xf32>, vector<8x8xf32> -> vector<8x8xf32>
    %cst_18 = arith.constant -1.000000e+30 : f32
    %47 = vector.broadcast %cst_18 : f32 to vector<8x8xf32>
    %48 = arith.select %6, %47, %46 : vector<8x8xi1>, vector<8x8xf32>
    %cst_19 = arith.constant dense<0xFF800000> : vector<8xf32>
    %49 = vector.multi_reduction <maximumf>, %48, %cst_19 [1] : vector<8x8xf32> to vector<8xf32>
    %50 = vector.shape_cast %49 : vector<8xf32> to vector<8x1xf32>
    %51 = vector.broadcast %50 : vector<8x1xf32> to vector<8x8xf32>
    %52 = arith.subf %48, %51 : vector<8x8xf32>
    %53 = math.exp %52 : vector<8x8xf32>
    %cst_20 = arith.constant dense<0.000000e+00> : vector<8xf32>
    %54 = vector.multi_reduction <add>, %53, %cst_20 [1] : vector<8x8xf32> to vector<8xf32>
    %55 = vector.shape_cast %54 : vector<8xf32> to vector<8x1xf32>
    %cst_21 = arith.constant dense<0.000000e+00> : vector<8x8xf32>
    %56 = tpu.matmul %53, %45, %cst_21 {dimension_numbers = #tpu.dot_dimension_numbers<[1], [0], [0], [1], [0, 0, 1, 1], [], []>} : vector<8x8xf32>, vector<8x8xf32>, vector<8x8xf32> -> vector<8x8xf32>
    %57 = tpu.reciprocal %55 {approx = true} : vector<8x1xf32> -> vector<8x1xf32>
    %58 = vector.broadcast %57 : vector<8x1xf32> to vector<8x8xf32>
    %59 = arith.mulf %56, %58 : vector<8x8xf32>
    %c0_22 = arith.constant 0 : index
    %c16 = arith.constant 16 : index
    %60 = vector.load %arg6[%c0_22, %c16] : memref<8x32xf32, #tpu.memory_space<vmem>>, vector<8x8xf32>
    tpu.vector_store %arg6[%c0_22, %c16], %59 {strides = array<i32>} : memref<8x32xf32, #tpu.memory_space<vmem>>, vector<8x8xf32>,
    %61 = vector.extract_strided_slice %3 {offsets = [0, 24], sizes = [8, 8], strides = [1, 1]} : vector<8x96xf32> to vector<8x8xf32>
    %62 = vector.extract_strided_slice %3 {offsets = [0, 56], sizes = [8, 8], strides = [1, 1]} : vector<8x96xf32> to vector<8x8xf32>
    %63 = vector.extract_strided_slice %3 {offsets = [0, 88], sizes = [8, 8], strides = [1, 1]} : vector<8x96xf32> to vector<8x8xf32>
    %cst_23 = arith.constant dense<0.000000e+00> : vector<8x8xf32>
    %64 = tpu.matmul %61, %62, %cst_23 {dimension_numbers = #tpu.dot_dimension_numbers<[1], [1], [0], [0], [0, 0, 1, 0], [], []>} : vector<8x8xf32>, vector<8x8xf32>, vector<8x8xf32> -> vector<8x8xf32>
    %cst_24 = arith.constant -1.000000e+30 : f32
    %65 = vector.broadcast %cst_24 : f32 to vector<8x8xf32>
    %66 = arith.select %6, %65, %64 : vector<8x8xi1>, vector<8x8xf32>
    %cst_25 = arith.constant dense<0xFF800000> : vector<8xf32>
    %67 = vector.multi_reduction <maximumf>, %66, %cst_25 [1] : vector<8x8xf32> to vector<8xf32>
    %68 = vector.shape_cast %67 : vector<8xf32> to vector<8x1xf32>
    %69 = vector.broadcast %68 : vector<8x1xf32> to vector<8x8xf32>
    %70 = arith.subf %66, %69 : vector<8x8xf32>
    %71 = math.exp %70 : vector<8x8xf32>
    %cst_26 = arith.constant dense<0.000000e+00> : vector<8xf32>
    %72 = vector.multi_reduction <add>, %71, %cst_26 [1] : vector<8x8xf32> to vector<8xf32>
    %73 = vector.shape_cast %72 : vector<8xf32> to vector<8x1xf32>
    %cst_27 = arith.constant dense<0.000000e+00> : vector<8x8xf32>
    %74 = tpu.matmul %71, %63, %cst_27 {dimension_numbers = #tpu.dot_dimension_numbers<[1], [0], [0], [1], [0, 0, 1, 1], [], []>} : vector<8x8xf32>, vector<8x8xf32>, vector<8x8xf32> -> vector<8x8xf32>
    %75 = tpu.reciprocal %73 {approx = true} : vector<8x1xf32> -> vector<8x1xf32>
    %76 = vector.broadcast %75 : vector<8x1xf32> to vector<8x8xf32>
    %77 = arith.mulf %74, %76 : vector<8x8xf32>
    %c0_28 = arith.constant 0 : index
    %c24 = arith.constant 24 : index
    %78 = vector.load %arg6[%c0_28, %c24] : memref<8x32xf32, #tpu.memory_space<vmem>>, vector<8x8xf32>
    tpu.vector_store %arg6[%c0_28, %c24], %77 {strides = array<i32>} : memref<8x32xf32, #tpu.memory_space<vmem>>, vector<8x8xf32>,
    %c0_29 = arith.constant 0 : index
    %c0_30 = arith.constant 0 : index
    %79 = vector.load %arg6[%c0_29, %c0_30] : memref<8x32xf32, #tpu.memory_space<vmem>>, vector<8x32xf32>
    %c0_31 = arith.constant 0 : index
    %c0_32 = arith.constant 0 : index
    %80 = vector.load %arg3[%c0_31, %c0_32] : memref<32x32xf32, #tpu.memory_space<vmem>>, vector<32x32xf32>
    %cst_33 = arith.constant dense<0.000000e+00> : vector<8x32xf32>
    %81 = tpu.matmul %79, %80, %cst_33 {dimension_numbers = #tpu.dot_dimension_numbers<[1], [0], [0], [1], [0, 0, 1, 1], [], []>} : vector<8x32xf32>, vector<32x32xf32>, vector<8x32xf32> -> vector<8x32xf32>
    %c0_34 = arith.constant 0 : index
    %c0_35 = arith.constant 0 : index
    %82 = vector.load %arg4[%c0_34, %c0_35] : memref<1x32xf32, #tpu.memory_space<vmem>>, vector<1x32xf32>
    %83 = vector.broadcast %82 : vector<1x32xf32> to vector<8x32xf32>
    %84 = arith.addf %81, %83 : vector<8x32xf32>
    %c0_36 = arith.constant 0 : index
    %c0_37 = arith.constant 0 : index
    %c0_38 = arith.constant 0 : index
    %85 = vector.load %arg5[%c0_36, %c0_37, %c0_38] : memref<1x8x32xf32, #tpu.memory_space<vmem>>, vector<1x8x32xf32>
    %86 = vector.shape_cast %85 : vector<1x8x32xf32> to vector<8x32xf32>
    %87 = vector.shape_cast %84 : vector<8x32xf32> to vector<1x8x32xf32>
    tpu.vector_store %arg5[%c0_36, %c0_37, %c0_38], %87 {strides = array<i32>} : memref<1x8x32xf32, #tpu.memory_space<vmem>>, vector<1x8x32xf32>,
    return
  }
  func.func @transform_0(%arg0: i32) -> (i32, i32, i32) {
    %c0_i32 = arith.constant 0 : i32
    %c0_i32_0 = arith.constant 0 : i32
    %c0_i32_1 = arith.constant 0 : i32
    return %arg0, %c0_i32, %c0_i32_0 : i32, i32, i32
  }
  func.func @transform_1(%arg0: i32) -> (i32, i32) {
    %c0_i32 = arith.constant 0 : i32
    %c0_i32_0 = arith.constant 0 : i32
    %c0_i32_1 = arith.constant 0 : i32
    return %c0_i32, %c0_i32_0 : i32, i32
  }
  func.func @transform_2(%arg0: i32) -> (i32, i32) {
    %c0_i32 = arith.constant 0 : i32
    %c0_i32_0 = arith.constant 0 : i32
    %c0_i32_1 = arith.constant 0 : i32
    return %c0_i32, %c0_i32_0 : i32, i32
  }
  func.func @transform_3(%arg0: i32) -> (i32, i32) {
    %c0_i32 = arith.constant 0 : i32
    %c0_i32_0 = arith.constant 0 : i32
    %c0_i32_1 = arith.constant 0 : i32
    return %c0_i32, %c0_i32_0 : i32, i32
  }
  func.func @transform_4(%arg0: i32) -> (i32, i32, i32) {
    %c0_i32 = arith.constant 0 : i32
    %c0_i32_0 = arith.constant 0 : i32
    %c0_i32_1 = arith.constant 0 : i32
    return %arg0, %c0_i32, %c0_i32_0 : i32, i32, i32
  }
}

</mosaic_0001>

<bundles_post_ra>
// kernel: tpu_custom_call.1
= control target key start
LH: loop header
LB: loop body
LE: loop exit
PB: predicated region body
PF: predicated region fallthrough
CT: control target
= control target key end

     0   :  { %9 = vsyncpa [#allocation4], 0  ;;  %s1947_s0 = inlined_call_operand.hbm [shape: f32[2,8,32], index: 0, kind: input, shape index: {}]   ;;  %s1948_s1 = inlined_call_operand.hbm [shape: f32[32,96], index: 1, kind: input, shape index: {}]   ;;  %s1949_s2 = inlined_call_operand.hbm [shape: f32[32,32], index: 2, kind: input, shape index: {}]   ;;  %s1950_s3 = inlined_call_operand.vmem [shape: f32[1,32], index: 3, kind: input, shape index: {}]   ;;  %s1951_s4 = inlined_call_operand.hbm [shape: f32[2,8,32], index: 4, kind: output, shape index: {}]  }
   0x1   :  { %11 = vsyncpa [#allocation4 + $0x1], 0 }
   0x2   :  { %12 = vsyncpa [#allocation7], 0 }
   0x3   :  { %13 = vsyncpa [#allocation5], 0 }
   0x4   :  { %15 = vsyncpa [#allocation5 + $0x1], 0  ;;  %s1637_s15 = smov 0   ;;  %s1639_s16 = smov 0  }
   0x5   :  { %s1641_s17 = smov 0   ;;  %s1643_s18 = smov 0  }
   0x6 LB: > { %s1658_s19 = sadd.s32 4294967295, %s1587_s18   ;;  %s1198_s20 = sadd.s32 4294967294, %s1587_s18   ;;  %s1587_s18 = sphi %s1643_s18, %s1971_s18   ;;  %s1583_s17 = sphi %s1641_s17, %s1970_s17   ;;  %s1579_s16 = sphi %s1639_s16, %s1969_s16   ;;  %s1575_s15 = sphi %s1637_s15, %s1968_s15  }
   0x7   : > { %p41_p0 = scmp.ne.s32.totalorder %s1579_s16, %s1575_s15  ;;  %p1952_p1 = scmp.eq.s32.totalorder %s1658_s19, 0 }
   0x8   : > { %p134_p3 = scmp.eq.s32.totalorder %s1198_s20, 1  ;;  %p1199_p5 = scmp.ge.s32.totalorder %s1587_s18, 1 }
   0x9   : > { %p1667_p4 = por %p1952_p1, %p41_p0  ;;  %p141_p7 = scmp.lt.s32.totalorder %s1587_s18, 3 }
   0xa   : > { %p1672_p6 = por %p134_p3, %p41_p0  ;;  %s1589_s24 = smov [#allocation6]  }
   0xb   : > { %s1955_s21 = scalar_select %p1667_p4, 1, 0 }
   0xc   : > { %s1956_s22 = scalar_select %p1672_p6, 1, 0 }
   0xd   : > { %p1677_p8 = pnand %p1199_p5, %p141_p7  ;;  %s153_s25 = sshll.u32 %s1589_s24, 4  ;;  %s1681_s25 = int_to_ptr.vmem [resolvable:$true] %s153_s25 }
   0xe   : > { %s1590_s27 = smov [#allocation8]   ;;  %s1431_s5 = scalar_lea.hbm %s1948_s1, 512 }
   0xf   : > { %p1341_p9 = pneg %p1677_p8  ;;  %s166_s28 = sshll.u32 %s1590_s27, 4  ;;  %s1692_s28 = int_to_ptr.vmem [resolvable:$true] %s166_s28 }
  0x10   : > { %p1432_p12 = scmp.ne.s32.totalorder %s1948_s1, %s1431_s5  ;;  %p1438_p5 = scmp.lt.u32.totalorder %s1431_s5, %s1948_s1 }
  0x11   : > { %p1688_p11 = pnand %p1341_p9, %p1952_p1 }
  0x13   : > { %p1433_p13 = pneg %p1688_p11 }
  0x15   : > { %p1434_p0 = pnand %p1433_p13, %p1432_p12 }
  0x17   : > { %p1435_p3 = pneg %p1434_p0 }
  0x19   : > { %p1440_p7 = pnand %p1438_p5, %p1435_p3 }
  0x1b   : > { %1443 = shalt.err (!%p1440_p7)
}
  0x1c   : > { %s1444_s10 = scalar_lea.vmem %s1681_s25, 512  ;;  %p1452_p2 = scmp.lt.s32.totalorder %s1681_s25, %s1681_s25 }
  0x1d   : > { %p1445_p9 = scmp.ne.s32.totalorder %s1681_s25, %s1444_s10  ;;  %p1453_p12 = scmp.lt.s32.totalorder %s1444_s10, %s1444_s10 }
  0x1f   : > { %p1447_p10 = pnand %p1445_p9, %p1433_p13  ;;  %p1454_p0 = por %p1453_p12, %p1452_p2 }
  0x21   : > { %p1448_p1 = pneg %p1447_p10 }
  0x23   : > { %p1455_p6 = pnand %p1454_p0, %p1448_p1 }
  0x25   : > { %1458 = shalt.err (!%p1455_p6)
}
  0x26   : > { %s1591_s11 = smov 128   ;;  %s1592_s12 = smov 8  }
  0x27   : > { %1344 = dma.hbm_to_vmem [thread:$0]  (!%p1688_p11), %s1948_s1, 512, %s1681_s25, [#allocation7], %s1591_s11, %s1591_s11, %s1592_s12  }
  0x28   : > { %s1459_s27 = scalar_lea.hbm %s1949_s2, 512 }
  0x29   : > { %p1460_p2 = scmp.ne.s32.totalorder %s1949_s2, %s1459_s27  ;;  %p1466_p10 = scmp.lt.u32.totalorder %s1459_s27, %s1949_s2 }
  0x2b   : > { %p1462_p1 = pnand %p1460_p2, %p1433_p13 }
  0x2d   : > { %p1463_p6 = pneg %p1462_p1 }
  0x2f   : > { %p1468_p3 = pnand %p1466_p10, %p1463_p6 }
  0x31   : > { %1471 = shalt.err (!%p1468_p3)
}
  0x32   : > { %s1472_s25 = scalar_lea.vmem %s1692_s28, 512  ;;  %p1480_p12 = scmp.lt.s32.totalorder %s1692_s28, %s1692_s28 }
  0x33   : > { %p1473_p5 = scmp.ne.s32.totalorder %s1692_s28, %s1472_s25  ;;  %p1481_p0 = scmp.lt.s32.totalorder %s1472_s25, %s1472_s25 }
  0x35   : > { %p1475_p7 = pnand %p1473_p5, %p1433_p13  ;;  %p1482_p2 = por %p1481_p0, %p1480_p12 }
  0x37   : > { %p1476_p9 = pneg %p1475_p7 }
  0x39   : > { %p1483_p1 = pnand %p1482_p2, %p1476_p9 }
  0x3b   : > { %1486 = shalt.err (!%p1483_p1)
}
  0x3c   : > { %1347 = dma.hbm_to_vmem [thread:$0]  (!%p1688_p11), %s1949_s2, 512, %s1692_s28, [#allocation7], %s1591_s11, %s1591_s11, %s1592_s12  }
  0x3d   : > { %s1747_s9 = sadd.s32 1, %s1587_s18   ;;  %s28_s26 = sadd.s32 1, %s1583_s17 }
  0x3e   : > { %s25_s10 = ssub.s32 %s1587_s18, %s1747_s9  ;;  %p35_p13 = scmp.ne.s32.totalorder %s1583_s17, %s1579_s16 }
  0x3f   : > { %p26_p6 = scmp.eq.s32.totalorder %s25_s10, 0  ;;  %p36_p10 = scmp.eq.s32.totalorder %s1587_s18, 0 }
  0x40   : > { %p1959_p3 = scmp.eq.s32.totalorder %s1658_s19, 1  ;;  %p1358_p7 = scmp.lt.s32.totalorder %s1587_s18, 2 }
  0x41   : > { %s1763_s14 = scalar_select %p26_p6, %s1583_s17, %s28_s26  }
  0x42   : > { %p1757_p5 = por %p1959_p3, %p35_p13  ;;  %p37_p9 = por %p36_p10, %p35_p13 }
  0x43   : > { %s183_s20 = sand.u32 1, %s1583_s17   ;;  %s1204_s28 = sshll.u32 %s1587_s18, 7 }
  0x44   : > { %s1960_s13 = scalar_select %p1757_p5, 1, 0 }
  0x45   : > { %s1203_s24 = sshll.u32 %s183_s20, 3  ;;  %s1770_s27 = scalar_lea.hbm %s1947_s0, %s1204_s28 }
  0x46   : > { %s187_s29 = scalar_lea.vmem [#allocation3], %s1203_s24  ;;  %p1774_p11 = pnand %p1358_p7, %p37_p9 }
  0x47   : > { %s194_s30 = sshll.u32 %s187_s29, 4  ;;  %s184_s6 = scalar_lea.sflag [#allocation4], %s183_s20  ;;  %s1772_s30 = int_to_ptr.vmem [resolvable:$true] %s194_s30 }
  0x48   : > { %s1487_s25 = scalar_lea.hbm %s1770_s27, 128  ;;  %p1489_p0 = pneg %p1774_p11 }
  0x49   : > { %p1488_p12 = scmp.ne.s32.totalorder %s1770_s27, %s1487_s25  ;;  %s1492_s26 = scalar_lea.hbm %s1947_s0, 256 }
  0x4a   : > { %p1493_p13 = scmp.lt.u32.totalorder %s1770_s27, %s1947_s0  ;;  %p1494_p6 = scmp.lt.u32.totalorder %s1492_s26, %s1487_s25 }
  0x4b   : > { %p1490_p2 = pnand %p1489_p0, %p1488_p12  ;;  %p1496_p3 = scmp.lt.u32.totalorder %s1487_s25, %s1770_s27 }
  0x4c   : > { %p1495_p10 = por %p1494_p6, %p1493_p13 }
  0x4d   : > { %p1491_p1 = pneg %p1490_p2 }
  0x4e   : > { %p1497_p7 = por %p1496_p3, %p1495_p10 }
  0x50   : > { %p1498_p9 = pnand %p1497_p7, %p1491_p1 }
  0x52   : > { %1501 = shalt.err (!%p1498_p9)
}
  0x53   : > { %s1502_s20 = scalar_lea.vmem %s1772_s30, 128  ;;  %s1593_s28 = smov [#allocation3]  }
  0x54   : > { %p1503_p12 = scmp.ne.s32.totalorder %s1772_s30, %s1502_s20  ;;  %s1507_s11 = sshll.u32 %s1593_s28, 4  ;;  %s1508_s11 = int_to_ptr.vmem [resolvable:$false] %s1507_s11 }
  0x55   : > { %s1509_s12 = scalar_lea.vmem %s1508_s11, 256  ;;  %p1510_p4 = scmp.lt.s32.totalorder %s1772_s30, %s1508_s11 }
  0x56   : > { %p1505_p2 = pnand %p1503_p12, %p1489_p0  ;;  %p1511_p13 = scmp.lt.s32.totalorder %s1509_s12, %s1502_s20 }
  0x58   : > { %p1506_p5 = pneg %p1505_p2  ;;  %p1512_p6 = por %p1511_p13, %p1510_p4 }
  0x5a   : > { %p1513_p10 = pnand %p1512_p6, %p1506_p5 }
  0x5c   : > { %1516 = shalt.err (!%p1513_p10)
}
  0x5d   : > { %1351 = dma.hbm_to_vmem [thread:$0]  (!%p1774_p11), %s1770_s27, 128, %s1772_s30, %s184_s6  }
  0x5e   : > { %203 = sbr.rel (%p1677_p8) target bundleno = 1764 (0x6e4), region = 36  ;;  %s1806_s29 = sand.u32 (!%p1677_p8), 1, %s1579_s16  }
  0x5f   : > { %s1206_s25 = sshll.u32 (!%p1677_p8), %s1806_s29, 3  ;;  %s206_s7 = scalar_lea.sflag (!%p1677_p8), [#allocation4], %s1806_s29 }
  0x60   : > { %s209_s8 = scalar_lea.vmem (!%p1677_p8), [#allocation3], %s1206_s25  ;;  %p1962_p4 = scmp.ne.s32.totalorder (!%p1677_p8), %s1955_s21, 0 }
  0x65   : > { %1562 = dma.done.wait (%p1962_p4), %s206_s7, 128  }
  0x66   : > { %1564 = vsyncadd (%p1962_p4), %s206_s7, 4294967168  ;;  %p1963_p5 = scmp.eq.s32.totalorder %s1658_s19, 0 }
  0x68   : > { %1566 = dma.done.wait (%p1963_p5), [#allocation7], 1024   ;;  %p1964_p8 = pmov %p1963_p5 }
  0x69   : > { %v1594_v0 = vmov 0.0|0.0   ;;  %vm1595_vm0 = vmmov 0   ;;  %v1596_v1 = vmov 0.0   ;;  %v243_v2 = vld [vmem:[#allocation6] sm:$0xff]  ;;  %v244_v3 = vld [vmem:[#allocation6 + $0x8] sm:$0xff]  ;;  %v245_v4 = vld [vmem:[#allocation6 + $0x10] sm:$0xff]  ;;  %v321_v19 = vlaneseq }
  0x6a   : > { %1568 = vsyncadd (%p1964_p8), [#allocation7], 4294966272  ;;  %1317 = vmatprep.subr.bf16.mxu0 %v1594_v0  ;;  %1263 = vmatprep.mubr.msk.f32.mxu0 %vm1595_vm0, %v1596_v1  ;;  %v1318_v5 = vpack.c.bf16 %v244_v3, %v243_v2  ;;  %v246_v6 = vld [vmem:[#allocation6 + $0x18] sm:$0xff]  ;;  %vm247_vm1 = vcmask 261120   ;;  %s1597_s21 = smov 64   ;;  %s1598_s23 = smov 96  }
  0x6b   : > { %1266 = vmatprep.subr.mxu1 %v1596_v1  ;;  %1268 = vmatprep.mubr.msk.f32.mxu1 %vm1595_vm0, %v1596_v1  ;;  %v1321_v7 = vpack.c.bf16 %v246_v6, %v245_v4  ;;  %v242_v8 = vld [vmem:[%s209_s8] sm:$0xff]  ;;  %s1599_s27 = smov 88   ;;  %s1600_s30 = smov 120   ;;  %vm329_vm2 = vcmask 64512   ;;  %v322_v20 = vshrl.u32 %v321_v19, 7  ;;  %v324_v21 = vand.u32 127, %v321_v19 }
  0x6c   : > { %1319 = vmatpush3.bf16.msra.mxu0 %v1318_v5  ;;  %s1601_s5 = smov 80   ;;  %s1602_s6 = smov 112   ;;  %vm663_vm4 = vcmask 130112   ;;  %vm835_vm5 = vcmask 195712   ;;  %vm1007_vm6 = vcmask 261312  }
  0x6d   : > { %1320 = vmatprep.subr.bf16.mxu0 %v1594_v0  ;;  %s1603_s26 = smov 72   ;;  %s1604_s10 = smov 104   ;;  %vm325_vm3 = vcmp.gt.s32.totalorder %v324_v21, %v322_v20 }
  0x6e   : > { %s1605_s24 = smov 56   ;;  %s1606_s20 = smov 40  }
  0x6f   : > { %s1607_s28 = smov 48   ;;  %s1608_s11 = smov 8  }
  0x70   : > { %1322 = vmatpush3.bf16.msra.mxu0 %v1321_v7  ;;  %v1010_v7 = vld [vmem:[#allocation8] sm:$0xff]  ;;  %s1609_s12 = smov 16   ;;  %s1610_s7 = smov 24  }
  0x71   : > { %1286 = vmatprep.subr.mxu0 %v1596_v1  ;;  %p1965_p0 = scmp.ne.s32.totalorder %s1960_s13, 0 }
  0x73   : > { %1264 = vmatmul.mubr.msk.f32.vlgmr.msra.gmra.mrb[0].mxu0 %vm247_vm1, %v242_v8  ;;  %v1011_v8 = vld [vmem:[#allocation8 + $0x8] sm:$0xff] }
  0x74   : > { %1288 = vmatprep.mubr.msk.f32.mxu0 %vm1595_vm0, %v1596_v1 }
 0x146   : > { %v1831_v9 = vpop.f32.mrb[0].mxu0 }
 0x147   : > { %414 = vrot.lane.b32.xlu1 %v1831_v9, %s1597_s21  ;;  %327 = vrot.lane.b32.xlu0 %v1831_v9, %s1598_s23  ;;  %v1265_v10 = vpop.f32.mrb[1].mxu0  ;;  %s1226_s23 = sshll.u32 %s1658_s19, 7 }
 0x148   : > { %v1013_v10 = vld [vmem:[#allocation8 + $0x18] sm:$0xff] }
 0x14b   : > { %495 = vrot.lane.b32.xlu1 %v1831_v9, %s1599_s27  ;;  %s241_s27 = scalar_lea.vmem [#allocation9], %s1206_s25  ;;  %s1611_s25 = smov [#allocation9]  }
 0x14f   : > { %493 = vrot.lane.b32.xlu1 %v1831_v9, %s1600_s30  ;;  %s1109_s30 = sshll.u32 %s241_s27, 4  ;;  %s1904_s30 = int_to_ptr.vmem [resolvable:$true] %s1109_s30 }
 0x150   : > { %s1517_s19 = scalar_lea.vmem %s1904_s30, 128 }
 0x151   : > { %p1518_p11 = scmp.ne.s32.totalorder %s1904_s30, %s1517_s19 }
 0x153   : > { %667 = vrot.lane.b32.xlu1 %v1831_v9, %s1601_s5  ;;  %p1519_p1 = pnand %p1518_p11, %p1965_p0 }
 0x155   : > { %p1520_p3 = pneg %p1519_p1 }
 0x157   : > { %665 = vrot.lane.b32.xlu1 %v1831_v9, %s1602_s6 }
 0x15b   : > { %839 = vrot.lane.b32.xlu1 %v1831_v9, %s1603_s26  ;;  %s1902_s26 = scalar_lea.hbm %s1951_s4, %s1226_s23 }
 0x15f   : > { %837 = vrot.lane.b32.xlu1 %v1831_v9, %s1604_s10  ;;  %s1096_s10 = scalar_lea.sflag [#allocation5], %s1806_s29 }
 0x1b9   : > { %v415_v11 = vpop.permute.xlu1 %414  ;;  %v328_v12 = vpop.permute.xlu0 %327 }
 0x1ba   : > { %1267 = vmatpush3.xpose.msk.msra.mxu1 %vm329_vm2, %v328_v12 }
 0x1bb   : > { %1271 = vmatprep.subr.mxu1 %v1596_v1 }
 0x1bd   : > { %v496_v13 = vpop.permute.xlu1 %495  ;;  %1269 = vmatmul.mubr.msk.f32.vlgmr.msra.gmra.mrb[0].mxu1 %vm329_vm2, %v1831_v9 }
 0x1be   : > { %1272 = vmatpush3.msra.mxu1 %v415_v11  ;;  %1273 = vmatprep.mubr.msk.f32.mxu1 %vm1595_vm0, %v1596_v1 }
 0x1bf   : > { %1276 = vmatprep.subr.mxu1 %v1596_v1 }
 0x1c1   : > { %v494_v14 = vpop.permute.xlu1 %493 }
 0x1c5   : > { %v668_v15 = vpop.permute.xlu1 %667 }
 0x1c6   : > { %1287 = vmatpush3.xpose.msk.msra.mxu0 %vm329_vm2, %v668_v15 }
 0x1c7   : > { %1296 = vmatprep.subr.mxu0 %v1596_v1 }
 0x1c9   : > { %v666_v16 = vpop.permute.xlu1 %665 }
 0x1ca   : > { %1289 = vmatmul.mubr.msk.f32.vlgmr.msra.gmra.mrb[2].mxu0 %vm329_vm2, %v666_v16 }
 0x1cb   : > { %1298 = vmatprep.mubr.msk.f32.mxu0 %vm1595_vm0, %v1596_v1 }
 0x1cd   : > { %v840_v17 = vpop.permute.xlu1 %839 }
 0x1ce   : > { %1297 = vmatpush3.xpose.msk.msra.mxu0 %vm329_vm2, %v840_v17 }
 0x1cf   : > { %1323 = vmatprep.subr.bf16.mxu0 %v1594_v0 }
 0x1d1   : > { %v838_v18 = vpop.permute.xlu1 %837 }
 0x1d2   : > { %1299 = vmatmul.mubr.msk.f32.vlgmr.msra.gmra.mrb[4].mxu0 %vm329_vm2, %v838_v18 }
 0x1d3   : > { %1314 = vmatprep.mubr.msk.f32.mxu0 %vm1595_vm0, %v1596_v1 }
 0x290   : > { %v400_v22 = vpop.f32.mrb[0].mxu1 }
 0x291   : > { %v404_v23 = vsel %vm325_vm3, -1e+30, %v400_v22  ;;  %v1270_v24 = vpop.f32.mrb[1].mxu1 }
 0x292   : > { %v405_v25 = vsel %vm329_vm2, %v404_v23, -inf }
 0x293   : > { %406 = vmax.xlane.f32.xlu0 %v405_v25 }
 0x29d   : > { %v739_v26 = vpop.f32.mrb[2].mxu0 }
 0x29e   : > { %v1290_v27 = vpop.f32.mrb[3].mxu0  ;;  %v743_v30 = vsel %vm325_vm3, -1e+30, %v739_v26 }
 0x29f   : > { %v744_v31 = vsel %vm329_vm2, %v743_v30, -inf  ;;  %v1223_v27 = vld [vmem:[%s1950_s3] ss:$0 sm:$0xff] }
 0x2a5   : > { %v911_v28 = vpop.f32.mrb[4].mxu0 }
 0x2a6   : > { %v1300_v29 = vpop.f32.mrb[5].mxu0  ;;  %v915_v32 = vsel %vm325_vm3, -1e+30, %v911_v28 }
 0x2a7   : > { %v916_v33 = vsel %vm329_vm2, %v915_v32, -inf }
 0x2a9   : > { %581 = vrot.lane.b32.xlu0 %v1831_v9, %s1605_s24  ;;  %s1521_s24 = sshll.u32 %s1611_s25, 4  ;;  %s1522_s24 = int_to_ptr.vmem [resolvable:$false] %s1521_s24 }
 0x2aa   : > { %p1524_p7 = scmp.lt.s32.totalorder %s1904_s30, %s1522_s24 }
 0x2c8   : > { %745 = vmax.xlane.f32.xlu0 %v744_v31 }
 0x2cc   : > { %917 = vmax.xlane.f32.xlu0 %v916_v33 }
 0x2e2   : > { %925 = vrot.lane.b32.xlu0 %v1831_v9, %s1606_s20  ;;  %s1523_s20 = scalar_lea.vmem %s1522_s24, 256 }
 0x2e3   : > { %p1525_p9 = scmp.lt.s32.totalorder %s1523_s20, %s1517_s19 }
 0x2e5   : > { %p1526_p12 = por %p1525_p9, %p1524_p7 }
 0x2e7   : > { %p1527_p2 = pnand %p1526_p12, %p1520_p3 }
 0x320   : > { %v407_v34 = vpop.xlane.xlu0 %406 }
 0x321   : > { %v408_v35 = vsub.f32 %v404_v23, %v407_v34 }
 0x323   : > { %v409_v36 = vmul.f32 1.442695, %v408_v35 }
 0x324   : > { %v582_v38 = vpop.permute.xlu0 %581 }
 0x325   : > { %1415 = vpow2.f32 %v409_v36 }
 0x32f   : > { %v1416_v37 = vpop.eup %1415 }
 0x330   : > { %1274 = vmatmul.mubr.msk.f32.vlgmr.msra.gmra.mrb[2].mxu1 %vm329_vm2, %v1416_v37  ;;  %v411_v62 = vsel %vm329_vm2, %v1416_v37, 0.0 }
 0x331   : > { %1277 = vmatpush3.xpose.msk.msra.mxu1 %vm329_vm2, %v496_v13  ;;  %1278 = vmatprep.mubr.msk.f32.mxu1 %vm1595_vm0, %v1596_v1 }
 0x332   : > { %1281 = vmatprep.subr.mxu1 %v1596_v1 }
 0x334   : > { %1279 = vmatmul.mubr.msk.f32.vlgmr.msra.gmra.mrb[4].mxu1 %vm329_vm2, %v494_v14 }
 0x335   : > { %1282 = vmatpush3.msra.mxu1 %v582_v38  ;;  %1283 = vmatprep.mubr.msk.f32.mxu1 %vm1595_vm0, %v1596_v1 }
 0x336   : > { %1291 = vmatprep.subr.mxu1 %v1596_v1 }
 0x355   : > { %v746_v45 = vpop.xlane.xlu0 %745 }
 0x356   : > { %v747_v46 = vsub.f32 %v743_v30, %v746_v45 }
 0x358   : > { %v748_v47 = vmul.f32 1.442695, %v747_v46 }
 0x359   : > { %v918_v50 = vpop.xlane.xlu0 %917 }
 0x35a   : > { %1417 = vpow2.f32 %v748_v47  ;;  %v919_v51 = vsub.f32 %v915_v32, %v918_v50 }
 0x35c   : > { %v920_v54 = vmul.f32 1.442695, %v919_v51 }
 0x35d   : > { %v926_v60 = vpop.permute.xlu0 %925 }
 0x364   : > { %v1418_v48 = vpop.eup %1417 }
 0x365   : > { %v750_v49 = vsel %vm329_vm2, %v1418_v48, 0.0 }
 0x403   : > { %v486_v39 = vpop.f32.mrb[2].mxu1 }
 0x404   : > { %v1275_v40 = vpop.f32.mrb[3].mxu1 }
 0x407   : > { %v567_v41 = vpop.f32.mrb[4].mxu1 }
 0x408   : > { %v571_v42 = vsel %vm325_vm3, -1e+30, %v567_v41  ;;  %v1280_v43 = vpop.f32.mrb[5].mxu1 }
 0x409   : > { %v572_v44 = vsel %vm329_vm2, %v571_v42, -inf }
 0x40a   : > { %573 = vmax.xlane.f32.xlu1 %v572_v44 }
 0x41b   : > { %753 = vrot.lane.b32.xlu1 %v1831_v9, %s1607_s28  ;;  %v1012_v9 = vld [vmem:[#allocation8 + $0x10] sm:$0xff] }
 0x41c   : > { %v1327_v13 = vpack.c.bf16 %v1013_v10, %v1012_v9 }
 0x43f   : > { %751 = vadd.xlane.f32.xlu1 %v750_v49 }
 0x497   : > { %v574_v52 = vpop.xlane.xlu1 %573 }
 0x498   : > { %v575_v53 = vsub.f32 %v571_v42, %v574_v52 }
 0x49a   : > { %v576_v55 = vmul.f32 1.442695, %v575_v53 }
 0x49b   : > { %v754_v57 = vpop.permute.xlu1 %753 }
 0x49c   : > { %1419 = vpow2.f32 %v576_v55 }
 0x49d   : > { %1421 = vpow2.f32 %v920_v54 }
 0x4a6   : > { %v1420_v56 = vpop.eup %1419 }
 0x4a7   : > { %1284 = vmatmul.mubr.msk.f32.vlgmr.msra.gmra.mrb[6].mxu1 %vm329_vm2, %v1420_v56  ;;  %v578_v58 = vsel %vm329_vm2, %v1420_v56, 0.0  ;;  %v1422_v59 = vpop.eup %1421 }
 0x4a8   : > { %1292 = vmatpush3.msra.mxu1 %v754_v57  ;;  %579 = vadd.xlane.f32.xlu0 %v578_v58  ;;  %v922_v61 = vsel %vm329_vm2, %v1422_v59, 0.0 }
 0x4a9   : > { %1293 = vmatprep.mubr.msk.f32.mxu1 %vm1595_vm0, %v1596_v1  ;;  %1301 = vmatprep.subr.mxu1 %v1596_v1 }
 0x4ab   : > { %1294 = vmatmul.mubr.msk.f32.vlgmr.msra.gmra.mrb[8].mxu1 %vm329_vm2, %v1418_v48 }
 0x4ac   : > { %1302 = vmatpush3.msra.mxu1 %v926_v60  ;;  %923 = vadd.xlane.f32.xlu0 %v922_v61 }
 0x4ad   : > { %1303 = vmatprep.mubr.msk.f32.mxu1 %vm1595_vm0, %v1596_v1  ;;  %v1324_v1 = vpack.c.bf16 %v1011_v8, %v1010_v7 }
 0x4af   : > { %1304 = vmatmul.mubr.msk.f32.vlgmr.msra.gmra.mrb[10].mxu1 %vm329_vm2, %v1422_v59  ;;  %1325 = vmatpush3.bf16.msra.mxu0 %v1324_v1 }
 0x4b0   : > { %412 = vadd.xlane.f32.xlu0 %v411_v62  ;;  %1326 = vmatprep.subr.bf16.mxu0 %v1594_v0 }
 0x4b3   : > { %1328 = vmatpush3.bf16.msra.mxu0 %v1327_v13 }
 0x4cc   : > { %v752_v6 = vpop.xlane.xlu1 %751 }
 0x535   : > { %v580_v63 = vpop.xlane.xlu0 %579 }
 0x539   : > { %v924_v2 = vpop.xlane.xlu0 %923 }
 0x53d   : > { %v413_v3 = vpop.xlane.xlu0 %412 }
 0x53e   : > { %1423 = vrcp.f32 %v413_v3 }
 0x53f   : > { %1425 = vrcp.f32 %v580_v63 }
 0x540   : > { %1427 = vrcp.f32 %v752_v6 }
 0x541   : > { %1429 = vrcp.f32 %v924_v2 }
 0x548   : > { %v1424_v4 = vpop.eup %1423 }
 0x549   : > { %v491_v5 = vmul.f32 %v1424_v4, %v486_v39  ;;  %v1426_v11 = vpop.eup %1425 }
 0x54a   : > { %v1428_v16 = vpop.eup %1427 }
 0x54b   : > { %492 = vst.msk [vmem:[#allocation2] sm:$0xff] %vm329_vm2, %v491_v5  ;;  %v1430_v20 = vpop.eup %1429 }
 0x57a   : > { %v653_v12 = vpop.f32.mrb[6].mxu1 }
 0x57b   : > { %v658_v14 = vmul.f32 %v1426_v11, %v653_v12  ;;  %v1285_v15 = vpop.f32.mrb[7].mxu1 }
 0x57d   : > { %660 = vrot.lane.b32.xlu0 %v658_v14, %s1608_s11 }
 0x57e   : > { %v825_v17 = vpop.f32.mrb[8].mxu1 }
 0x57f   : > { %v830_v18 = vmul.f32 %v1428_v16, %v825_v17  ;;  %v1295_v19 = vpop.f32.mrb[9].mxu1 }
 0x581   : > { %832 = vrot.lane.b32.xlu1 %v830_v18, %s1609_s12 }
 0x582   : > { %v997_v21 = vpop.f32.mrb[10].mxu1 }
 0x583   : > { %v1002_v22 = vmul.f32 %v1430_v20, %v997_v21  ;;  %v1305_v23 = vpop.f32.mrb[11].mxu1 }
 0x585   : > { %1004 = vrot.lane.b32.xlu0 %v1002_v22, %s1610_s7 }
 0x5ef   : > { %v661_v24 = vpop.permute.xlu0 %660 }
 0x5f0   : > { %664 = vst.msk [vmem:[#allocation2] sm:$0xff] %vm663_vm4, %v661_v24 }
 0x5f3   : > { %v833_v0 = vpop.permute.xlu1 %832 }
 0x5f4   : > { %836 = vst.msk [vmem:[#allocation2] sm:$0xff] %vm835_vm5, %v833_v0 }
 0x5f7   : > { %v1005_v25 = vpop.permute.xlu0 %1004 }
 0x5f8   : > { %1008 = vst.msk [vmem:[#allocation2] sm:$0xff] %vm1007_vm6, %v1005_v25 }
 0x5ff   : > { %v1009_v26 = vld [vmem:[#allocation2] sm:$0xff] }
 0x600   : > { %1315 = vmatmul.mubr.msk.f32.vlgmr.msra.gmra.mrb[6].mxu0 %vm247_vm1, %v1009_v26 }
 0x6d3   : > { %v1090_v28 = vpop.f32.mrb[6].mxu0 }
 0x6d4   : > { %v1091_v29 = vadd.f32 %v1223_v27, %v1090_v28  ;;  %v1316_v30 = vpop.f32.mrb[7].mxu0 }
 0x6d6   : > { %1094 = vst.msk [vmem:[%s241_s27] sm:$0xff] %vm247_vm1, %v1091_v29 }
 0x6d7   : > { %1530 = shalt.err (!%p1527_p2)
}
 0x6d8   : > { %s1531_s29 = scalar_lea.hbm %s1902_s26, 128  ;;  %s1535_s12 = scalar_lea.hbm %s1951_s4, 256 }
 0x6d9   : > { %p1532_p13 = scmp.ne.s32.totalorder %s1902_s26, %s1531_s29  ;;  %p1536_p4 = scmp.lt.u32.totalorder %s1902_s26, %s1951_s4 }
 0x6da   : > { %p1537_p5 = scmp.lt.u32.totalorder %s1535_s12, %s1531_s29  ;;  %p1539_p11 = scmp.lt.u32.totalorder %s1531_s29, %s1902_s26 }
 0x6db   : > { %p1533_p6 = pnand %p1532_p13, %p1965_p0 }
 0x6dc   : > { %p1538_p8 = por %p1537_p5, %p1536_p4 }
 0x6dd   : > { %p1534_p10 = pneg %p1533_p6 }
 0x6de   : > { %p1540_p1 = por %p1539_p11, %p1538_p8 }
 0x6e0   : > { %p1541_p3 = pnand %p1540_p1, %p1534_p10 }
 0x6e2   : > { %1544 = shalt.err (!%p1541_p3)
}
 0x6e3   : > { %1339 = dma.vmem_to_hbm [thread:$0]  (%p1965_p0), %s1904_s30, 128, %s1902_s26, %s1096_s10  }
 0x6e4 PF: > { %s1121_s21 = sand.u32 1, %s1575_s15   ;;  %p1966_p7 = scmp.ne.s32.totalorder %s1956_s22, 0 }
 0x6e5   : > { %p1967_p9 = scmp.ge.s32.totalorder %s1587_s18, 2  ;;  %s1122_s23 = scalar_lea.sflag [#allocation5], %s1121_s21 }
 0x6e7   : > { %p1353_p12 = pnand %p1967_p9, %p1966_p7 }
 0x6e9   : > { %1570 = dma.done.wait (!%p1353_p12), %s1122_s23, 128  }
 0x6ea   : > { %1572 = vsyncadd (!%p1353_p12), %s1122_s23, 4294967168  ;;  %p18_p2 = scmp.ge.s32.totalorder %s1747_s9, 4   ;;  %s1968_s15 = smov %s1579_s16 }
 0x6eb   : > { %s1969_s16 = smov %s1583_s17  ;;  %s1970_s17 = smov %s1763_s14 }
 0x6ec   : > { %s1971_s18 = smov %s1747_s9  ;;  %20 = sbr.rel (!%p18_p2) target bundleno = 6 (0x6), region = 89 }
 0x6f3   :  { %1127 = vsyncpa [#allocation4], 1 }
 0x6f4   :  { %1129 = vsyncpa [#allocation4 + $0x1], 1 }
 0x6f5   :  { %1130 = vsyncpa [#allocation7], 1 }
 0x6f6   :  { %1131 = vsyncpa [#allocation5], 1 }
 0x6f7   :  { %1133 = vsyncpa [#allocation5 + $0x1], 1 }

</bundles_post_ra>
